<compile_context>
chip_gen: v6e
topology: v6e:2x2x1
jax: 0.10.0
libtpu: 0.0.40
codegen_flags: <defaults>
</compile_context>

<pallas_src>
import functools

import jax
import jax.numpy as jnp
from jax.experimental import pallas as pl
from jax.experimental.pallas import tpu as pltpu


def _round_up(x, m):
    return ((x + m - 1) // m) * m


def _encoder_kernel(x_ref, w1_ref, b1_ref, w2_ref, b2_ref, o_ref):
    """One row-block of the (flattened) batch per grid step.

    x_ref  : (TB, D_in)
    w1_ref : (D_in, H1)   fc1 weight transposed to (in, out)
    b1_ref : (1, H1)
    w2_ref : (H1, H2)     fc2 weight transposed to (in, out)
    b2_ref : (1, H2)
    o_ref  : (TB, H2)
    """
    x = x_ref[...].astype(jnp.float32)

    # ---- fc1 + LeakyReLU(0.2) ----
    h1 = jnp.dot(x, w1_ref[...], preferred_element_type=jnp.float32)
    h1 = h1 + b1_ref[...]
    h1 = jnp.where(h1 >= 0.0, h1, 0.2 * h1)

    # ---- fc2 + LeakyReLU(0.2) ----
    h2 = jnp.dot(h1, w2_ref[...], preferred_element_type=jnp.float32)
    h2 = h2 + b2_ref[...]
    h2 = jnp.where(h2 >= 0.0, h2, 0.2 * h2)

    o_ref[...] = h2.astype(o_ref.dtype)


@functools.partial(jax.jit, static_argnames=("block_m",))
def simple_encoder_forward(x, fc1_w, fc1_b, fc2_w, fc2_b, *, block_m=128):
    """x: (..., input_size).  Weights in PyTorch layouts:
       fc1_w: (16, input_size), fc1_b: (16,)
       fc2_w: (8, 16),          fc2_b: (8,)
    Returns (..., 8).
    """
    orig_lead = x.shape[:-1]
    d_in = x.shape[-1]
    h1 = fc1_w.shape[0]
    h2 = fc2_w.shape[0]

    # Fold all leading (batch/seq/...) dims into the matmul M dimension.
    m = 1
    for d in orig_lead:
        m *= d
    x2d = x.reshape(m, d_in)

    # Row block: multiple of 8 sublanes, capped at block_m; pad rows to fit.
    tb = min(block_m, _round_up(m, 8))
    mp = _round_up(m, tb)
    if mp != m:
        x2d = jnp.pad(x2d, ((0, mp - m), (0, 0)))

    # Layout glue: (out, in) -> (in, out); biases as (1, C) rows.
    w1 = jnp.transpose(fc1_w).astype(jnp.float32)   # (D_in, H1)
    w2 = jnp.transpose(fc2_w).astype(jnp.float32)   # (H1, H2)
    b1 = fc1_b.reshape(1, h1).astype(jnp.float32)
    b2 = fc2_b.reshape(1, h2).astype(jnp.float32)

    out = pl.pallas_call(
        _encoder_kernel,
        out_shape=jax.ShapeDtypeStruct((mp, h2), x.dtype),
        grid=(mp // tb,),
        in_specs=[
            pl.BlockSpec((tb, d_in), lambda i: (i, 0)),
            pl.BlockSpec((d_in, h1), lambda i: (0, 0)),
            pl.BlockSpec((1, h1), lambda i: (0, 0)),
            pl.BlockSpec((h1, h2), lambda i: (0, 0)),
            pl.BlockSpec((1, h2), lambda i: (0, 0)),
        ],
        out_specs=pl.BlockSpec((tb, h2), lambda i: (i, 0)),
        compiler_params=pltpu.CompilerParams(
            dimension_semantics=("parallel",)),
    )(x2d, w1, b1, w2, b2)

    if mp != m:
        out = out[:m]
    return out.reshape(*orig_lead, h2)


def reference_forward(x, fc1_w, fc1_b, fc2_w, fc2_b):
    """Pure-JAX reference matching PyTorch SimpleEncoder semantics."""
    def leaky(v):
        return jnp.where(v >= 0.0, v, 0.2 * v)
    y = leaky(x @ fc1_w.T + fc1_b)
    y = leaky(y @ fc2_w.T + fc2_b)
    return y


if __name__ == "__main__":
    # Small shapes consistent with the module: x is (batch, input_size).
    B = 4
    input_size = 8
    H1, H2 = 16, 8

    key = jax.random.PRNGKey(0)
    ks = jax.random.split(key, 5)
    x = jax.random.normal(ks[0], (B, input_size), jnp.float32)

    # Deterministic synthetic parameters in PyTorch layouts.
    fc1_w = 0.1 * jax.random.normal(ks[1], (H1, input_size), jnp.float32)
    fc1_b = 0.1 * jax.random.normal(ks[2], (H1,), jnp.float32)
    fc2_w = 0.1 * jax.random.normal(ks[3], (H2, H1), jnp.float32)
    fc2_b = 0.1 * jax.random.normal(ks[4], (H2,), jnp.float32)

    out = simple_encoder_forward(x, fc1_w, fc1_b, fc2_w, fc2_b)
    out = jax.block_until_ready(out)

    ref = reference_forward(x, fc1_w, fc1_b, fc2_w, fc2_b)
    assert out.shape == (B, H2), out.shape
    assert jnp.allclose(out, ref, atol=1e-5, rtol=1e-5), (
        float(jnp.max(jnp.abs(out - ref))))

    print("KERNEL_OK")
</pallas_src>

<mosaic_0001>
module attributes {stable_mosaic.version = 11 : i64} {
  func.func @_encoder_kernel(%arg0: i32, %arg1: memref<8x8xf32, #tpu.memory_space<vmem>>, %arg2: memref<8x16xf32, #tpu.memory_space<vmem>>, %arg3: memref<1x16xf32, #tpu.memory_space<vmem>>, %arg4: memref<16x8xf32, #tpu.memory_space<vmem>>, %arg5: memref<1x8xf32, #tpu.memory_space<vmem>>, %arg6: memref<8x8xf32, #tpu.memory_space<vmem>>) attributes {dimension_semantics = [#tpu.dimension_semantics<parallel>], iteration_bounds = array<i64: 1>, scalar_prefetch = 0 : i64, scratch_operands = 0 : i64, tpu.core_type = #tpu.core_type<tc>, window_params = [{transform_indices = @transform_0, window_bounds = array<i64: 8, 8>}, {pipeline_mode = #tpu.pipeline_mode<synchronous>, transform_indices = @transform_1, window_bounds = array<i64: 8, 16>}, {pipeline_mode = #tpu.pipeline_mode<synchronous>, transform_indices = @transform_2, window_bounds = array<i64: 1, 16>}, {pipeline_mode = #tpu.pipeline_mode<synchronous>, transform_indices = @transform_3, window_bounds = array<i64: 16, 8>}, {pipeline_mode = #tpu.pipeline_mode<synchronous>, transform_indices = @transform_4, window_bounds = array<i64: 1, 8>}, {transform_indices = @transform_5, window_bounds = array<i64: 8, 8>}]} {
    %c0 = arith.constant 0 : index
    %c0_0 = arith.constant 0 : index
    %0 = vector.load %arg1[%c0, %c0_0] : memref<8x8xf32, #tpu.memory_space<vmem>>, vector<8x8xf32>
    %c0_1 = arith.constant 0 : index
    %c0_2 = arith.constant 0 : index
    %1 = vector.load %arg2[%c0_1, %c0_2] : memref<8x16xf32, #tpu.memory_space<vmem>>, vector<8x16xf32>
    %cst = arith.constant dense<0.000000e+00> : vector<8x16xf32>
    %2 = tpu.matmul %0, %1, %cst {dimension_numbers = #tpu.dot_dimension_numbers<[1], [0], [0], [1], [0, 0, 1, 1], [], []>} : vector<8x8xf32>, vector<8x16xf32>, vector<8x16xf32> -> vector<8x16xf32>
    %c0_3 = arith.constant 0 : index
    %c0_4 = arith.constant 0 : index
    %3 = vector.load %arg3[%c0_3, %c0_4] : memref<1x16xf32, #tpu.memory_space<vmem>>, vector<1x16xf32>
    %4 = vector.broadcast %3 : vector<1x16xf32> to vector<8x16xf32>
    %5 = arith.addf %2, %4 : vector<8x16xf32>
    %cst_5 = arith.constant 0.000000e+00 : f32
    %6 = vector.broadcast %cst_5 : f32 to vector<8x16xf32>
    %7 = arith.cmpf oge, %5, %6 : vector<8x16xf32>
    %cst_6 = arith.constant 2.000000e-01 : f32
    %8 = vector.broadcast %cst_6 : f32 to vector<8x16xf32>
    %9 = arith.mulf %8, %5 : vector<8x16xf32>
    %10 = arith.select %7, %5, %9 : vector<8x16xi1>, vector<8x16xf32>
    %c0_7 = arith.constant 0 : index
    %c0_8 = arith.constant 0 : index
    %11 = vector.load %arg4[%c0_7, %c0_8] : memref<16x8xf32, #tpu.memory_space<vmem>>, vector<16x8xf32>
    %cst_9 = arith.constant dense<0.000000e+00> : vector<8x8xf32>
    %12 = tpu.matmul %10, %11, %cst_9 {dimension_numbers = #tpu.dot_dimension_numbers<[1], [0], [0], [1], [0, 0, 1, 1], [], []>} : vector<8x16xf32>, vector<16x8xf32>, vector<8x8xf32> -> vector<8x8xf32>
    %c0_10 = arith.constant 0 : index
    %c0_11 = arith.constant 0 : index
    %13 = vector.load %arg5[%c0_10, %c0_11] : memref<1x8xf32, #tpu.memory_space<vmem>>, vector<1x8xf32>
    %14 = vector.broadcast %13 : vector<1x8xf32> to vector<8x8xf32>
    %15 = arith.addf %12, %14 : vector<8x8xf32>
    %cst_12 = arith.constant 0.000000e+00 : f32
    %16 = vector.broadcast %cst_12 : f32 to vector<8x8xf32>
    %17 = arith.cmpf oge, %15, %16 : vector<8x8xf32>
    %cst_13 = arith.constant 2.000000e-01 : f32
    %18 = vector.broadcast %cst_13 : f32 to vector<8x8xf32>
    %19 = arith.mulf %18, %15 : vector<8x8xf32>
    %20 = arith.select %17, %15, %19 : vector<8x8xi1>, vector<8x8xf32>
    %c0_14 = arith.constant 0 : index
    %c0_15 = arith.constant 0 : index
    %21 = vector.load %arg6[%c0_14, %c0_15] : memref<8x8xf32, #tpu.memory_space<vmem>>, vector<8x8xf32>
    tpu.vector_store %arg6[%c0_14, %c0_15], %20 {strides = array<i32>} : memref<8x8xf32, #tpu.memory_space<vmem>>, vector<8x8xf32>,
    return
  }
  func.func @transform_0(%arg0: i32) -> (i32, i32) {
    %c0_i32 = arith.constant 0 : i32
    %c0_i32_0 = arith.constant 0 : i32
    return %arg0, %c0_i32 : i32, i32
  }
  func.func @transform_1(%arg0: i32) -> (i32, i32) {
    %c0_i32 = arith.constant 0 : i32
    %c0_i32_0 = arith.constant 0 : i32
    %c0_i32_1 = arith.constant 0 : i32
    return %c0_i32, %c0_i32_0 : i32, i32
  }
  func.func @transform_2(%arg0: i32) -> (i32, i32) {
    %c0_i32 = arith.constant 0 : i32
    %c0_i32_0 = arith.constant 0 : i32
    %c0_i32_1 = arith.constant 0 : i32
    return %c0_i32, %c0_i32_0 : i32, i32
  }
  func.func @transform_3(%arg0: i32) -> (i32, i32) {
    %c0_i32 = arith.constant 0 : i32
    %c0_i32_0 = arith.constant 0 : i32
    %c0_i32_1 = arith.constant 0 : i32
    return %c0_i32, %c0_i32_0 : i32, i32
  }
  func.func @transform_4(%arg0: i32) -> (i32, i32) {
    %c0_i32 = arith.constant 0 : i32
    %c0_i32_0 = arith.constant 0 : i32
    %c0_i32_1 = arith.constant 0 : i32
    return %c0_i32, %c0_i32_0 : i32, i32
  }
  func.func @transform_5(%arg0: i32) -> (i32, i32) {
    %c0_i32 = arith.constant 0 : i32
    %c0_i32_0 = arith.constant 0 : i32
    return %arg0, %c0_i32 : i32, i32
  }
}

</mosaic_0001>

<bundles_post_ra>
// kernel: simple_encoder_forward.1
= control target key start
LH: loop header
LB: loop body
LE: loop exit
PB: predicated region body
PF: predicated region fallthrough
CT: control target
= control target key end

     0   :  { %vm29_vm0 = vcmask 64512   ;;  %v220_v0 = vmov 0.0   ;;  %vm221_vm1 = vmmov 0   ;;  %vm115_vm3 = vcmask 130048   ;;  %s275_s1 = inlined_call_operand.vmem [shape: f32[8,16], index: 1, kind: input, shape index: {}]   ;;  %s276_s0 = inlined_call_operand.vmem [shape: f32[8,8], index: 0, kind: input, shape index: {}]   ;;  %s277_s3 = inlined_call_operand.vmem [shape: f32[16,8], index: 3, kind: input, shape index: {}]   ;;  %s278_s2 = inlined_call_operand.vmem [shape: f32[1,16], index: 2, kind: input, shape index: {}]   ;;  %s279_s4 = inlined_call_operand.vmem [shape: f32[1,8], index: 4, kind: input, shape index: {}]   ;;  %s280_s5 = inlined_call_operand.vmem [shape: f32[8,8], index: 5, kind: output, shape index: {}]  }
   0x1   :  { %206 = vmatprep.subr.mxu0 %v220_v0  ;;  %v21_v1 = vld [vmem:[%s275_s1] sm:$0xff]  ;;  %208 = vmatprep.mubr.msk.f32.mxu0 %vm221_vm1, %v220_v0  ;;  %v107_v3 = vld [vmem:[%s277_s3 + $0x8] sm:$0xff] }
   0x2   :  { %v20_v2 = vld [vmem:[%s276_s0] sm:$0xff]  ;;  %207 = vmatpush3.msra.mxu0 %v21_v1  ;;  %211 = vmatprep.subr.mxu1 %v220_v0 }
   0x3   :  { %209 = vmatmul.mubr.msk.f32.vlgmr.msra.gmra.mxu0 %vm29_vm0, %v20_v2  ;;  %215 = vmatprep.mubr.msk.f32.mxu1 %vm221_vm1, %v220_v0  ;;  %v106_v4 = vld [vmem:[%s277_s3] sm:$0xff] }
   0x4   :  { %212 = vmatpush3.msra.mxu1 %v107_v3  ;;  %v197_v5 = vld [vmem:[%s278_s2] ss:$0 sm:$0xff] }
   0x5   :  { %213 = vmatprep.subr.mxu1 %v220_v0  ;;  %v199_v11 = vld [vmem:[%s279_s4] ss:$0 sm:$0xff] }
   0x6   :  { %214 = vmatpush3.msra.mxu1 %v106_v4 }
  0xc3   :  { %v99_v6 = vpop.f32.mrf.mxu0 }
  0xc4   :  { %v100_v7 = vadd.f32 %v197_v5, %v99_v6 }
  0xc5   :  { %v210_v8 = vpop.f32.mrf.mxu0 }
  0xc6   :  { %vm103_vm2 = vcmp.ge.f32.partialorder %v100_v7, 0.0  ;;  %v104_v9 = vmul.f32 0.2, %v100_v7 }
  0xc8   :  { %v105_v10 = vsel %vm103_vm2, %v100_v7, %v104_v9 }
  0xc9   :  { %216 = vmatmul.mubr.msk.f32.vlgmr.msra.gmra.mxu1 %vm115_vm3, %v105_v10 }
 0x189   :  { %v185_v12 = vpop.f32.mrf.mxu1 }
 0x18a   :  { %v186_v13 = vadd.f32 %v199_v11, %v185_v12 }
 0x18b   :  { %v217_v14 = vpop.f32.mrf.mxu1 }
 0x18c   :  { %vm189_vm4 = vcmp.ge.f32.partialorder %v186_v13, 0.0  ;;  %v190_v15 = vmul.f32 0.2, %v186_v13 }
 0x18e   :  { %v191_v16 = vsel %vm189_vm4, %v186_v13, %v190_v15 }
 0x18f   :  { %192 = vst.msk [vmem:[%s280_s5] sm:$0xff] %vm29_vm0, %v191_v16 }

</bundles_post_ra>
